<compile_context>
chip_gen: v6e
topology: v6e:2x2x1
jax: 0.10.0
libtpu: 0.0.40
codegen_flags: <defaults>
</compile_context>

<pallas_src>
import functools

import jax
import jax.numpy as jnp
from jax.experimental import pallas as pl
from jax.experimental.pallas import tpu as pltpu


def _round_up(x: int, m: int) -> int:
    return ((x + m - 1) // m) * m


def _vmem_capacity_bytes() -> int:
    try:
        return int(pltpu.get_tpu_info().vmem_capacity_bytes)
    except Exception:
        return 64 << 20  # conservative fallback (v7x per-TC VMEM)


def _resident_spec(block_shape, index_map):
    """Single-buffered BlockSpec for operands with a constant index_map."""
    try:
        return pl.BlockSpec(block_shape, index_map, pipeline_mode=pl.Buffered(1))
    except TypeError:  # older BlockSpec signature without pipeline_mode
        return pl.BlockSpec(block_shape, index_map)


# ---------------------------------------------------------------------------
# Kernels
# ---------------------------------------------------------------------------
def _denoiser_kernel_resident(x_ref, w1_ref, b1_ref, w2_ref, b2_ref, o_ref):
    # Cast x tile to the weight compute dtype (bf16) in VMEM (no HBM pass).
    x = x_ref[...].astype(w1_ref.dtype)
    h = jnp.dot(x, w1_ref[...], preferred_element_type=jnp.float32)
    h = jnp.maximum(h + b1_ref[...], 0.0)
    out = jnp.dot(h.astype(w2_ref.dtype), w2_ref[...],
                  preferred_element_type=jnp.float32)
    o_ref[...] = (out + b2_ref[...]).astype(o_ref.dtype)


def _denoiser_kernel_hchunk(x_ref, w1_ref, b1_ref, w2_ref, b2_ref, o_ref, acc_ref):
    # Hidden-chunked path: out += relu(x @ W1[:, h0:h1] + b1[h0:h1]) @ W2[h0:h1, :]
    # ReLU is per hidden unit, so the chunked math is exact.
    h_idx = pl.program_id(1)

    @pl.when(h_idx == 0)
    def _():
        acc_ref[...] = jnp.zeros_like(acc_ref)

    x = x_ref[...].astype(w1_ref.dtype)
    h = jnp.dot(x, w1_ref[...], preferred_element_type=jnp.float32)
    h = jnp.maximum(h + b1_ref[...], 0.0)
    acc_ref[...] += jnp.dot(h.astype(w2_ref.dtype), w2_ref[...],
                            preferred_element_type=jnp.float32)

    @pl.when(h_idx == pl.num_programs(1) - 1)
    def _():
        o_ref[...] = (acc_ref[...] + b2_ref[...]).astype(o_ref.dtype)


# ---------------------------------------------------------------------------
# Parameter preparation (call once per parameter set)
# ---------------------------------------------------------------------------
def prepare_params(w1, b1, w2, b2, *, use_bf16=True):
    """Pad feature dims to multiples of 128 (lane-dense, exact zero padding) and
    cast weights to the MXU compute dtype. Do this ONCE, outside the per-call path."""
    D, H = w1.shape
    Dp, Hp = _round_up(D, 128), _round_up(H, 128)
    cdt = jnp.bfloat16 if use_bf16 else w1.dtype
    b1 = jnp.reshape(b1, (1, -1))
    b2 = jnp.reshape(b2, (1, -1))
    w1p = jnp.zeros((Dp, Hp), cdt).at[:D, :H].set(w1.astype(cdt))
    b1p = jnp.zeros((1, Hp), jnp.float32).at[:, :H].set(b1.astype(jnp.float32))
    w2p = jnp.zeros((Hp, Dp), cdt).at[:H, :D].set(w2.astype(cdt))
    b2p = jnp.zeros((1, Dp), jnp.float32).at[:, :D].set(b2.astype(jnp.float32))
    return w1p, b1p, w2p, b2p


# ---------------------------------------------------------------------------
# Forward pass
# ---------------------------------------------------------------------------
@functools.partial(jax.jit, static_argnames=("batch_tile", "max_hidden_chunk"))
def denoiser_forward(x, w1p, b1p, w2p, b2p, *, batch_tile=None, max_hidden_chunk=None):
    """y = relu(x @ W1 + b1) @ W2 + b2 with padded/cast params from prepare_params."""
    B, D = x.shape
    Dp, Hp = w1p.shape
    assert w2p.shape == (Hp, Dp) and D <= Dp
    out_dtype = x.dtype
    cdt = w1p.dtype

    cap = _vmem_capacity_bytes()
    budget = cap * 3 // 4  # ~25% headroom for compiler scratch / semaphores

    if batch_tile is None:
        # 512-row tiles on 128 MiB VMEM parts (v5e/v6e), 256 on v7x (64 MiB).
        batch_tile = 512 if budget > (48 << 20) else 256

    # Balanced batch tiles: minimize padding, keep rows a multiple of 16 (bf16
    # sublane packing) and guarantee >=4 grid steps when B allows (pipelining
    # overlap + v7x dual-TC sharding).
    n_b = max(pl.cdiv(B, batch_tile), min(4, pl.cdiv(B, 16)))
    TB = _round_up(pl.cdiv(B, n_b), 16)
    n_b = pl.cdiv(B, TB)
    Bp = n_b * TB

    x_isz = jnp.dtype(x.dtype).itemsize
    o_isz = jnp.dtype(out_dtype).itemsize
    w_isz = jnp.dtype(cdt).itemsize

    def resident_est(tb):
        return (2 * tb * Dp * x_isz + 2 * tb * Dp * o_isz        # x/out tiles (2-buf)
                + (Dp * Hp + Hp * Dp) * w_isz + (Hp + Dp) * 4     # resident weights (1-buf)
                + tb * Hp * 4 + tb * Dp * 4)                      # f32 intermediates

    def chunked_est(tb, th):
        return (2 * tb * Dp * x_isz + 2 * tb * Dp * o_isz
                + 2 * (Dp * th + th * Dp) * w_isz + 2 * th * 4 + Dp * 4
                + tb * Dp * 4                                     # f32 accumulator
                + tb * th * 4)                                    # f32 hidden chunk

    force_chunk = max_hidden_chunk is not None and max_hidden_chunk < Hp
    use_resident = (not force_chunk) and resident_est(TB) <= budget

    if not use_resident:
        # Largest hidden chunk (multiple of 128, dividing Hp) that fits the budget.
        nblk = Hp // 128
        cmax = nblk if max_hidden_chunk is None else max(1, min(nblk, max_hidden_chunk // 128))
        cands = [c for c in range(cmax, 0, -1) if nblk % c == 0]  # descending, contains 1
        TH = 128 * cands[-1]
        for c in cands:
            if chunked_est(TB, 128 * c) <= budget:
                TH = 128 * c
                break
        if chunked_est(TB, TH) > budget:
            while TB > 16 and chunked_est(TB, TH) > budget:
                TB = max(16, _round_up(TB // 2, 16))
            n_b = pl.cdiv(B, TB)
            Bp = n_b * TB
        n_h = Hp // TH
        vmem_est = chunked_est(TB, TH)
    else:
        vmem_est = resident_est(TB)

    # x: pass straight through when already lane-dense and tile-aligned (no extra
    # HBM pass); otherwise pad -- and cast to bf16 while we touch it anyway.
    if D == Dp and Bp == B:
        x_in = x
    else:
        x_in = jnp.zeros((Bp, Dp), cdt).at[:B, :D].set(x.astype(cdt))

    vmem_limit = min(int(vmem_est * 5 // 4) + (2 << 20), int(budget))
    in_bytes = sum(int(a.size) * a.dtype.itemsize for a in (x_in, w1p, b1p, w2p, b2p))
    cost = pl.CostEstimate(flops=4 * Bp * Dp * Hp, transcendentals=0,
                           bytes_accessed=in_bytes + Bp * Dp * o_isz)

    if use_resident:
        out = pl.pallas_call(
            _denoiser_kernel_resident,
            out_shape=jax.ShapeDtypeStruct((Bp, Dp), out_dtype),
            grid=(n_b,),
            in_specs=[
                pl.BlockSpec((TB, Dp), lambda i: (i, 0)),          # x: tiled over batch
                _resident_spec((Dp, Hp), lambda i: (0, 0)),        # W1: resident, 1-buf
                _resident_spec((1, Hp), lambda i: (0, 0)),         # b1
                _resident_spec((Hp, Dp), lambda i: (0, 0)),        # W2
                _resident_spec((1, Dp), lambda i: (0, 0)),         # b2
            ],
            out_specs=pl.BlockSpec((TB, Dp), lambda i: (i, 0)),
            compiler_params=pltpu.CompilerParams(
                dimension_semantics=("parallel",),
                vmem_limit_bytes=vmem_limit),
            cost_estimate=cost,
        )(x_in, w1p, b1p, w2p, b2p)
    else:
        out = pl.pallas_call(
            _denoiser_kernel_hchunk,
            out_shape=jax.ShapeDtypeStruct((Bp, Dp), out_dtype),
            grid=(n_b, n_h),
            in_specs=[
                pl.BlockSpec((TB, Dp), lambda i, h: (i, 0)),       # x
                pl.BlockSpec((Dp, TH), lambda i, h: (0, h)),       # W1 hidden chunk
                pl.BlockSpec((1, TH), lambda i, h: (0, h)),        # b1 hidden chunk
                pl.BlockSpec((TH, Dp), lambda i, h: (h, 0)),       # W2 hidden chunk
                pl.BlockSpec((1, Dp), lambda i, h: (0, 0)),        # b2
            ],
            out_specs=pl.BlockSpec((TB, Dp), lambda i, h: (i, 0)),
            scratch_shapes=[pltpu.VMEM((TB, Dp), jnp.float32)],
            compiler_params=pltpu.CompilerParams(
                dimension_semantics=("parallel", "arbitrary"),
                vmem_limit_bytes=vmem_limit),
            cost_estimate=cost,
        )(x_in, w1p, b1p, w2p, b2p)

    if Bp == B and Dp == D:
        return out
    return out[:B, :D]


# ---------------------------------------------------------------------------
# Init mirroring nn.Linear's U(-1/sqrt(fan_in), 1/sqrt(fan_in))
# ---------------------------------------------------------------------------
def init_params(key, data_dim, hidden_dim):
    k1, k2, k3, k4 = jax.random.split(key, 4)
    bound1 = 1.0 / jnp.sqrt(data_dim)
    bound2 = 1.0 / jnp.sqrt(hidden_dim)
    w1 = jax.random.uniform(k1, (data_dim, hidden_dim), jnp.float32, -bound1, bound1)
    b1 = jax.random.uniform(k2, (1, hidden_dim), jnp.float32, -bound1, bound1)
    w2 = jax.random.uniform(k3, (hidden_dim, data_dim), jnp.float32, -bound2, bound2)
    b2 = jax.random.uniform(k4, (1, data_dim), jnp.float32, -bound2, bound2)
    return w1, b1, w2, b2


if __name__ == "__main__":
    key = jax.random.PRNGKey(0)
    to_bf = lambda a: a.astype(jnp.bfloat16).astype(jnp.float32)

    # --- small demo shapes (resident-weight path) ---
    data_dim, hidden_dim, batch = 16, 32, 8
    kx, kp = jax.random.split(key)
    x = jax.random.normal(kx, (batch, data_dim), jnp.float32)
    w1, b1, w2, b2 = init_params(kp, data_dim, hidden_dim)
    params = prepare_params(w1, b1, w2, b2)

    out = jax.block_until_ready(denoiser_forward(x, *params))
    assert out.shape == (batch, data_dim)
    assert out.dtype == x.dtype

    # Reference 1: pure-f32 math (loose tolerance, bf16 MXU inputs).
    ref_f32 = jnp.maximum(x @ w1 + b1, 0.0) @ w2 + b2
    assert jnp.allclose(out, ref_f32, atol=2e-2, rtol=2e-2)

    # Reference 2: f32 math on bf16-rounded operands (tight tolerance).
    h_ref = jnp.maximum(to_bf(x) @ to_bf(w1) + b1, 0.0)
    ref_bf = to_bf(h_ref) @ to_bf(w2) + b2
    assert jnp.allclose(out, ref_bf, atol=1e-3, rtol=1e-3)

    # --- exercise the hidden-chunked fallback + no-pad x fast path ---
    data_dim2, hidden_dim2, batch2 = 256, 384, 64
    kx2, kp2 = jax.random.split(kp)
    x2 = jax.random.normal(kx2, (batch2, data_dim2), jnp.float32)
    w1b, b1b, w2b, b2b = init_params(kp2, data_dim2, hidden_dim2)
    params2 = prepare_params(w1b, b1b, w2b, b2b)

    out2 = jax.block_until_ready(
        denoiser_forward(x2, *params2, max_hidden_chunk=128))
    h2 = jnp.maximum(to_bf(x2) @ to_bf(w1b) + b1b, 0.0)
    ref2 = to_bf(h2) @ to_bf(w2b) + b2b
    assert out2.shape == (batch2, data_dim2)
    assert jnp.allclose(out2, ref2, atol=5e-3, rtol=5e-3)

    print("KERNEL_OK")
</pallas_src>

<mosaic_0001>
module attributes {stable_mosaic.version = 11 : i64} {
  func.func @_denoiser_kernel_resident(%arg0: i32, %arg1: memref<16x128xbf16, #tpu.memory_space<vmem>>, %arg2: memref<128x128xbf16, #tpu.memory_space<vmem>>, %arg3: memref<1x128xf32, #tpu.memory_space<vmem>>, %arg4: memref<128x128xbf16, #tpu.memory_space<vmem>>, %arg5: memref<1x128xf32, #tpu.memory_space<vmem>>, %arg6: memref<16x128xf32, #tpu.memory_space<vmem>>) attributes {dimension_semantics = [#tpu.dimension_semantics<parallel>], iteration_bounds = array<i64: 1>, scalar_prefetch = 0 : i64, scratch_operands = 0 : i64, tpu.core_type = #tpu.core_type<tc>, window_params = [{transform_indices = @transform_0, window_bounds = array<i64: 16, 128>}, {pipeline_mode = #tpu.pipeline_mode<synchronous>, transform_indices = @transform_1, window_bounds = array<i64: 128, 128>}, {pipeline_mode = #tpu.pipeline_mode<synchronous>, transform_indices = @transform_2, window_bounds = array<i64: 1, 128>}, {pipeline_mode = #tpu.pipeline_mode<synchronous>, transform_indices = @transform_3, window_bounds = array<i64: 128, 128>}, {pipeline_mode = #tpu.pipeline_mode<synchronous>, transform_indices = @transform_4, window_bounds = array<i64: 1, 128>}, {transform_indices = @transform_5, window_bounds = array<i64: 16, 128>}]} {
    %c0 = arith.constant 0 : index
    %c0_0 = arith.constant 0 : index
    %0 = vector.load %arg1[%c0, %c0_0] : memref<16x128xbf16, #tpu.memory_space<vmem>>, vector<16x128xbf16>
    %c0_1 = arith.constant 0 : index
    %c0_2 = arith.constant 0 : index
    %1 = vector.load %arg2[%c0_1, %c0_2] : memref<128x128xbf16, #tpu.memory_space<vmem>>, vector<128x128xbf16>
    %cst = arith.constant dense<0.000000e+00> : vector<16x128xf32>
    %2 = tpu.matmul %0, %1, %cst {dimension_numbers = #tpu.dot_dimension_numbers<[1], [0], [0], [1], [0, 0, 1, 1], [], []>} : vector<16x128xbf16>, vector<128x128xbf16>, vector<16x128xf32> -> vector<16x128xf32>
    %c0_3 = arith.constant 0 : index
    %c0_4 = arith.constant 0 : index
    %3 = vector.load %arg3[%c0_3, %c0_4] : memref<1x128xf32, #tpu.memory_space<vmem>>, vector<1x128xf32>
    %4 = vector.broadcast %3 : vector<1x128xf32> to vector<16x128xf32>
    %5 = arith.addf %2, %4 : vector<16x128xf32>
    %cst_5 = arith.constant 0.000000e+00 : f32
    %6 = vector.broadcast %cst_5 : f32 to vector<16x128xf32>
    %7 = arith.maximumf %5, %6 : vector<16x128xf32>
    %8 = arith.truncf %7 : vector<16x128xf32> to vector<16x128xbf16>
    %c0_6 = arith.constant 0 : index
    %c0_7 = arith.constant 0 : index
    %9 = vector.load %arg4[%c0_6, %c0_7] : memref<128x128xbf16, #tpu.memory_space<vmem>>, vector<128x128xbf16>
    %cst_8 = arith.constant dense<0.000000e+00> : vector<16x128xf32>
    %10 = tpu.matmul %8, %9, %cst_8 {dimension_numbers = #tpu.dot_dimension_numbers<[1], [0], [0], [1], [0, 0, 1, 1], [], []>} : vector<16x128xbf16>, vector<128x128xbf16>, vector<16x128xf32> -> vector<16x128xf32>
    %c0_9 = arith.constant 0 : index
    %c0_10 = arith.constant 0 : index
    %11 = vector.load %arg5[%c0_9, %c0_10] : memref<1x128xf32, #tpu.memory_space<vmem>>, vector<1x128xf32>
    %12 = vector.broadcast %11 : vector<1x128xf32> to vector<16x128xf32>
    %13 = arith.addf %10, %12 : vector<16x128xf32>
    %c0_11 = arith.constant 0 : index
    %c0_12 = arith.constant 0 : index
    %14 = vector.load %arg6[%c0_11, %c0_12] : memref<16x128xf32, #tpu.memory_space<vmem>>, vector<16x128xf32>
    tpu.vector_store %arg6[%c0_11, %c0_12], %13 {strides = array<i32>} : memref<16x128xf32, #tpu.memory_space<vmem>>, vector<16x128xf32>,
    return
  }
  func.func @transform_0(%arg0: i32) -> (i32, i32) {
    %c0_i32 = arith.constant 0 : i32
    %c0_i32_0 = arith.constant 0 : i32
    return %arg0, %c0_i32 : i32, i32
  }
  func.func @transform_1(%arg0: i32) -> (i32, i32) {
    %c0_i32 = arith.constant 0 : i32
    %c0_i32_0 = arith.constant 0 : i32
    %c0_i32_1 = arith.constant 0 : i32
    return %c0_i32, %c0_i32_0 : i32, i32
  }
  func.func @transform_2(%arg0: i32) -> (i32, i32) {
    %c0_i32 = arith.constant 0 : i32
    %c0_i32_0 = arith.constant 0 : i32
    %c0_i32_1 = arith.constant 0 : i32
    return %c0_i32, %c0_i32_0 : i32, i32
  }
  func.func @transform_3(%arg0: i32) -> (i32, i32) {
    %c0_i32 = arith.constant 0 : i32
    %c0_i32_0 = arith.constant 0 : i32
    %c0_i32_1 = arith.constant 0 : i32
    return %c0_i32, %c0_i32_0 : i32, i32
  }
  func.func @transform_4(%arg0: i32) -> (i32, i32) {
    %c0_i32 = arith.constant 0 : i32
    %c0_i32_0 = arith.constant 0 : i32
    %c0_i32_1 = arith.constant 0 : i32
    return %c0_i32, %c0_i32_0 : i32, i32
  }
  func.func @transform_5(%arg0: i32) -> (i32, i32) {
    %c0_i32 = arith.constant 0 : i32
    %c0_i32_0 = arith.constant 0 : i32
    return %arg0, %c0_i32 : i32, i32
  }
}

</mosaic_0001>

<bundles_post_ra>
// kernel: denoiser_forward.1
= control target key start
LH: loop header
LB: loop body
LE: loop exit
PB: predicated region body
PF: predicated region fallthrough
CT: control target
= control target key end

     0   :  { %10 = vsyncpa [#allocation3], 0  ;;  %s493_s0 = inlined_call_operand.vmem [shape: bf16[16,128], index: 0, kind: input, shape index: {}]   ;;  %s494_s1 = inlined_call_operand.hbm [shape: bf16[128,128], index: 1, kind: input, shape index: {}]   ;;  %s495_s2 = inlined_call_operand.vmem [shape: f32[1,128], index: 2, kind: input, shape index: {}]   ;;  %s496_s3 = inlined_call_operand.hbm [shape: bf16[128,128], index: 3, kind: input, shape index: {}]   ;;  %s497_s4 = inlined_call_operand.vmem [shape: f32[1,128], index: 4, kind: input, shape index: {}]   ;;  %s498_s5 = inlined_call_operand.vmem [shape: f32[16,128], index: 5, kind: output, shape index: {}]  }
   0x1   :  { %11 = vsyncpa [#allocation5], 0  ;;  %s436_s18 = smov [#allocation2]  }
   0x2   :  { %s19_s19 = sshll.u32 %s436_s18, 4  ;;  %s20_s19 = int_to_ptr.vmem [resolvable:$true] %s19_s19 }
   0x3   :  { %s400_s20 = scalar_lea.vmem %s20_s19, 1024  ;;  %p405_p1 = scmp.lt.s32.totalorder %s20_s19, %s20_s19 }
   0x4   :  { %p401_p0 = scmp.ne.s32.totalorder %s20_s19, %s400_s20  ;;  %p406_p2 = scmp.lt.s32.totalorder %s400_s20, %s400_s20 }
   0x6   :  { %p407_p3 = por %p406_p2, %p405_p1 }
   0x8   :  { %p408_p4 = pnand %p407_p3, %p401_p0 }
   0xa   :  { %411 = shalt.err (!%p408_p4)
}
   0xb   :  { %s437_s21 = smov 64   ;;  %s438_s22 = smov 4  }
   0xc   :  { %25 = dma.hbm_to_vmem [thread:$0]  %s494_s1, 1024, %s20_s19, [#allocation3], %s437_s21, %s437_s21, %s438_s22  }
   0xd   :  { %s439_s25 = smov [#allocation4]  }
   0xe   :  { %s33_s26 = sshll.u32 %s439_s25, 4  ;;  %s34_s26 = int_to_ptr.vmem [resolvable:$true] %s33_s26 }
   0xf   :  { %s420_s27 = scalar_lea.vmem %s34_s26, 1024  ;;  %p425_p6 = scmp.lt.s32.totalorder %s34_s26, %s34_s26 }
  0x10   :  { %p421_p5 = scmp.ne.s32.totalorder %s34_s26, %s420_s27  ;;  %p426_p7 = scmp.lt.s32.totalorder %s420_s27, %s420_s27 }
  0x12   :  { %p427_p8 = por %p426_p7, %p425_p6 }
  0x14   :  { %p428_p9 = pnand %p427_p8, %p421_p5 }
  0x16   :  { %431 = shalt.err (!%p428_p9)
}
  0x17   :  { %39 = dma.hbm_to_vmem [thread:$0]  %s496_s3, 1024, %s34_s26, [#allocation5], %s437_s21, %s437_s21, %s438_s22  }
  0x18   :  { %432 = dma.done.wait [#allocation3], 1024  }
  0x19   :  { %433 = vsyncadd [#allocation3], 4294966272 }
  0x1a   :  { %434 = dma.done.wait [#allocation5], 1024  }
  0x1b   :  { %435 = vsyncadd [#allocation5], 4294966272  ;;  %v440_v0 = vmov 0.0   ;;  %vm441_vm0 = vmmov 0   ;;  %v375_v1 = vld [vmem:[#allocation2 + $0x38] sm:$0xff]   ;;  %v376_v2 = vld [vmem:[#allocation2 + $0x30] sm:$0xff]  }
  0x1c   :  { %329 = vmatprep.subr.bf16.mxu0 %v440_v0  ;;  %345 = vmatprep.mubr.msk.bf16.mxu0 %vm441_vm0, %v440_v0  ;;  %v377_v3 = vld [vmem:[#allocation2 + $0x28] sm:$0xff]   ;;  %v384_v4 = vld [vmem:[#allocation4 + $0x38] sm:$0xff]   ;;  %v378_v5 = vld [vmem:[#allocation2 + $0x20] sm:$0xff]  }
  0x1d   :  { %349 = vmatprep.subr.bf16.mxu1 %v440_v0  ;;  %365 = vmatprep.mubr.msk.bf16.mxu1 %vm441_vm0, %v440_v0  ;;  %v385_v6 = vld [vmem:[#allocation4 + $0x30] sm:$0xff]   ;;  %v379_v7 = vld [vmem:[#allocation2 + $0x18] sm:$0xff]   ;;  %v386_v8 = vld [vmem:[#allocation4 + $0x28] sm:$0xff]  }
  0x1e   :  { %330 = vmatpush3.bf16.msra.mxu0 %v375_v1  ;;  %350 = vmatpush3.bf16.msra.mxu1 %v384_v4  ;;  %v380_v9 = vld [vmem:[#allocation2 + $0x10] sm:$0xff]   ;;  %v387_v10 = vld [vmem:[#allocation4 + $0x20] sm:$0xff]   ;;  %v381_v11 = vld [vmem:[#allocation2 + $0x8] sm:$0xff]  }
  0x1f   :  { %331 = vmatprep.subr.bf16.mxu0 %v440_v0  ;;  %351 = vmatprep.subr.bf16.mxu1 %v440_v0  ;;  %v388_v12 = vld [vmem:[#allocation4 + $0x18] sm:$0xff]   ;;  %v382_v13 = vld [vmem:[#allocation2] sm:$0xff]   ;;  %v389_v15 = vld [vmem:[#allocation4 + $0x10] sm:$0xff]  }
  0x20   :  { %v383_v14 = vld [vmem:[%s493_s0] sm:$0xff]   ;;  %v390_v16 = vld [vmem:[#allocation4 + $0x8] sm:$0xff]  }
  0x21   :  { %v391_v17 = vld [vmem:[#allocation4] sm:$0xff]  }
  0x22   :  { %332 = vmatpush3.bf16.msra.mxu0 %v376_v2  ;;  %352 = vmatpush3.bf16.msra.mxu1 %v385_v6  ;;  %v292_v18 = vld [vmem:[%s495_s2] ss:$0 sm:$0xff] }
  0x23   :  { %333 = vmatprep.subr.bf16.mxu0 %v440_v0  ;;  %353 = vmatprep.subr.bf16.mxu1 %v440_v0  ;;  %v302_v28 = vld [vmem:[%s497_s4] ss:$0 sm:$0xff] }
  0x26   :  { %334 = vmatpush3.bf16.msra.mxu0 %v377_v3  ;;  %354 = vmatpush3.bf16.msra.mxu1 %v386_v8 }
  0x27   :  { %335 = vmatprep.subr.bf16.mxu0 %v440_v0  ;;  %355 = vmatprep.subr.bf16.mxu1 %v440_v0 }
  0x2a   :  { %336 = vmatpush3.bf16.msra.mxu0 %v378_v5  ;;  %356 = vmatpush3.bf16.msra.mxu1 %v387_v10 }
  0x2b   :  { %337 = vmatprep.subr.bf16.mxu0 %v440_v0  ;;  %357 = vmatprep.subr.bf16.mxu1 %v440_v0 }
  0x2e   :  { %338 = vmatpush3.bf16.msra.mxu0 %v379_v7  ;;  %358 = vmatpush3.bf16.msra.mxu1 %v388_v12 }
  0x2f   :  { %339 = vmatprep.subr.bf16.mxu0 %v440_v0  ;;  %359 = vmatprep.subr.bf16.mxu1 %v440_v0 }
  0x32   :  { %340 = vmatpush3.bf16.msra.mxu0 %v380_v9  ;;  %360 = vmatpush3.bf16.msra.mxu1 %v389_v15 }
  0x33   :  { %341 = vmatprep.subr.bf16.mxu0 %v440_v0  ;;  %361 = vmatprep.subr.bf16.mxu1 %v440_v0 }
  0x36   :  { %342 = vmatpush3.bf16.msra.mxu0 %v381_v11  ;;  %362 = vmatpush3.bf16.msra.mxu1 %v390_v16 }
  0x37   :  { %343 = vmatprep.subr.bf16.mxu0 %v440_v0  ;;  %363 = vmatprep.subr.bf16.mxu1 %v440_v0 }
  0x3a   :  { %344 = vmatpush3.bf16.msra.mxu0 %v382_v13  ;;  %364 = vmatpush3.bf16.msra.mxu1 %v391_v17 }
  0x3d   :  { %346 = vmatmul.mubr.bf16.vlgmr.msra.gmra.mxu0 %v383_v14 }
  0xfd   :  { %v162_v19 = vpop.f32.mrf.mxu0 }
  0xfe   :  { %v163_v21 = vadd.f32 %v292_v18, %v162_v19 }
  0xff   :  { %v347_v20 = vpop.f32.mrf.mxu0 }
 0x100   :  { %v169_v25 = vmax.f32 %v163_v21, 0.0 }
 0x101   :  { %v165_v22 = vpop.f32.mrf.mxu0 }
 0x102   :  { %v166_v23 = vadd.f32 %v292_v18, %v165_v22 }
 0x103   :  { %v348_v24 = vpop.f32.mrf.mxu0 }
 0x104   :  { %v170_v26 = vmax.f32 %v166_v23, 0.0 }
 0x106   :  { %v171_v27 = vpack.c.bf16 %v170_v26, %v169_v25 }
 0x108   :  { %366 = vmatmul.mubr.bf16.vlgmr.msra.gmra.mxu1 %v171_v27 }
 0x1c8   :  { %v277_v29 = vpop.f32.mrf.mxu1 }
 0x1c9   :  { %v278_v30 = vadd.f32 %v302_v28, %v277_v29 }
 0x1ca   :  { %v367_v31 = vpop.f32.mrf.mxu1 }
 0x1cb   :  { %284 = vst [vmem:[%s498_s5] sm:$0xff] %v278_v30 }
 0x1cc   :  { %v280_v32 = vpop.f32.mrf.mxu1 }
 0x1cd   :  { %v281_v33 = vadd.f32 %v302_v28, %v280_v32 }
 0x1ce   :  { %v368_v34 = vpop.f32.mrf.mxu1 }
 0x1cf   :  { %285 = vst [vmem:[%s498_s5 + $0x8] sm:$0xff] %v281_v33 }
 0x1d0   :  { %290 = vsyncpa [#allocation3], 1 }
 0x1d1   :  { %291 = vsyncpa [#allocation5], 1 }

</bundles_post_ra>
